<compile_context>
chip_gen: v6e
topology: v6e:2x2x1
jax: 0.10.0
libtpu: 0.0.40
codegen_flags: <defaults>
</compile_context>

<pallas_src>
import jax
import jax.numpy as jnp
from jax.experimental import pallas as pl
from jax.experimental.pallas import tpu as pltpu


def _silu(x):
    return x * jax.nn.sigmoid(x)


def _round_up(x, m):
    return ((x + m - 1) // m) * m


def _pad2(a, rows, cols):
    return jnp.pad(a, ((0, rows - a.shape[0]), (0, cols - a.shape[1])))


# ---------------------------------------------------------------------------
# Pass 1: partial hyperedge features
#   E_partial[c] = sum_{i in split c}  Ht_scaled[:, tile_i] @ Y[tile_i, :]
# Grid: (n_splits ["parallel"], tiles_per_split ["arbitrary"]).
# Output block is resident across the reduction axis; accumulate in-place.
# ---------------------------------------------------------------------------
def _edge_feat_kernel(ht_ref, y_ref, e_ref):
    i = pl.program_id(1)

    @pl.when(i == 0)
    def _():
        e_ref[...] = jnp.zeros_like(e_ref)

    # bf16 x bf16 -> f32 accumulation on the MXU.
    e_ref[...] += jnp.dot(ht_ref[...], y_ref[...],
                          preferred_element_type=jnp.float32)


# ---------------------------------------------------------------------------
# Pass 2: per node tile (fully parallel, megacore-shardable):
#   node  = H_scaled_tile @ E                      (1/node_deg pre-folded)
#   out   = SiLU(node @ W_proj + b_fused + SiLU(temb_tile) @ W_time + b_time)
# ---------------------------------------------------------------------------
def _node_out_kernel(h_ref, e_ref, temb_ref,
                     w_proj_ref, b_fused_ref, w_time_ref, b_time_ref, out_ref):
    node = jnp.dot(h_ref[...], e_ref[...],
                   preferred_element_type=jnp.float32)          # [TN, Cout_p] f32

    hidden = jnp.dot(node.astype(jnp.bfloat16), w_proj_ref[...],
                     preferred_element_type=jnp.float32) + b_fused_ref[...]

    t = temb_ref[...].astype(jnp.float32)
    t = t * jax.nn.sigmoid(t)                                   # SiLU in f32 (EUP)
    t_proj = jnp.dot(t.astype(jnp.bfloat16), w_time_ref[...],
                     preferred_element_type=jnp.float32) + b_time_ref[...]

    out_ref[...] = _silu(hidden + t_proj).astype(out_ref.dtype)


def conv_block_forward(x, H, temb, params, *, tile_n=512):
    """ConvBlock forward. Returns (hidden_state [N, Cout], (zeros_like(x),))."""
    assert tile_n % 8 == 0
    N, Cin = x.shape
    M = H.shape[1]
    Ct = temb.shape[1]
    Cout = params["w_lin"].shape[1]

    f32, bf16 = jnp.float32, jnp.bfloat16

    # ---- tiling: split pass-1 reduction across 2 slabs when possible so both
    # v7x TensorCores get work (harmless size-1 axis on v5e/v6e).
    n_tiles = -(-N // tile_n)
    n_splits = 2 if n_tiles >= 2 else 1
    n_tiles_total = _round_up(n_tiles, n_splits)
    half = n_tiles_total // n_splits
    N_p = n_tiles_total * tile_n

    Cout_p = _round_up(Cout, 128)
    M_p = _round_up(M, 128)
    Ct_p = _round_up(Ct, 128)

    # ---- wrapper-side precompute (plain XLA, all cheap) ----------------------
    # Y = X @ W_lin at TRUE Cin (no 4->128 padding), then pad/cast for streaming.
    y = x.astype(f32) @ params["w_lin"].astype(f32)              # [N, Cout] f32
    y_p = _pad2(y, N_p, Cout_p).astype(bf16)                     # [N_p, Cout_p]

    H_p = _pad2(H.astype(f32), N_p, M_p)                         # padded 0/1 incidence
    temb_p = _pad2(temb.astype(f32), N_p, Ct_p).astype(bf16)

    # degrees are global over N: precompute here, fold reciprocals into H so
    # the kernels see only lane-dense operands.
    edge_deg = jnp.sum(H_p, axis=0)                              # [M_p]
    node_deg = jnp.sum(H_p, axis=1)                              # [N_p]
    b_inv = jnp.where(edge_deg > 0, 1.0 / edge_deg, 0.0)
    d_inv = jnp.where(node_deg > 0, 1.0 / node_deg, 0.0)
    ht_scaled = (H_p.T * b_inv[:, None]).astype(bf16)            # [M_p, N_p]
    h_scaled = (H_p * d_inv[:, None]).astype(bf16)               # [N_p, M_p]

    w_proj = _pad2(params["w_proj"].astype(f32), Cout_p, Cout_p).astype(bf16)
    w_time = _pad2(params["w_time"].astype(f32), Ct_p, Cout_p).astype(bf16)
    b_conv = _pad2(params["b_conv"].astype(f32), 1, Cout_p)
    b_proj = _pad2(params["b_proj"].astype(f32), 1, Cout_p)
    b_time = _pad2(params["b_time"].astype(f32), 1, Cout_p)
    # fold conv bias through proj_down: (z + b_conv) @ Wp + b_proj  (exact, f32)
    b_fused = b_conv @ _pad2(params["w_proj"].astype(f32), Cout_p, Cout_p) + b_proj

    # 48 MiB: ample for these tiles and leaves headroom under v7x's 64 MiB
    # physical VMEM; raise to 64-96 MiB on v5e/v6e only if tile_n >= 1024.
    vmem_limit = 48 * 1024 * 1024
    cparams_red = pltpu.CompilerParams(
        dimension_semantics=("parallel", "arbitrary"),
        vmem_limit_bytes=vmem_limit,
    )
    cparams_par = pltpu.CompilerParams(
        dimension_semantics=("parallel",),
        vmem_limit_bytes=vmem_limit,
    )

    # ---- pass 1: partial hyperedge features per split, reduce over node tiles
    e_partial = pl.pallas_call(
        _edge_feat_kernel,
        out_shape=jax.ShapeDtypeStruct((n_splits, M_p, Cout_p), f32),
        grid_spec=pltpu.PrefetchScalarGridSpec(
            num_scalar_prefetch=0,
            grid=(n_splits, half),
            in_specs=[
                # H^T (with 1/edge_deg folded in), column tile of this split
                pl.BlockSpec((M_p, tile_n), lambda c, i: (0, c * half + i)),
                # Y tile of this split
                pl.BlockSpec((tile_n, Cout_p), lambda c, i: (c * half + i, 0)),
            ],
            # per-split resident accumulator slab (first dim squeezed)
            out_specs=pl.BlockSpec((None, M_p, Cout_p), lambda c, i: (c, 0, 0)),
        ),
        compiler_params=cparams_red,
    )(ht_scaled, y_p)

    # tiny XLA reduction combines the per-core partial sums
    e_feat = jnp.sum(e_partial, axis=0).astype(bf16)             # [M_p, Cout_p]

    # ---- pass 2: per node tile output (fully parallel) ----
    hidden_p = pl.pallas_call(
        _node_out_kernel,
        out_shape=jax.ShapeDtypeStruct((N_p, Cout_p), x.dtype),
        grid_spec=pltpu.PrefetchScalarGridSpec(
            num_scalar_prefetch=0,
            grid=(n_tiles_total,),
            in_specs=[
                pl.BlockSpec((tile_n, M_p), lambda i: (i, 0)),      # H tile (1/deg folded)
                pl.BlockSpec((M_p, Cout_p), lambda i: (0, 0)),      # E (resident)
                pl.BlockSpec((tile_n, Ct_p), lambda i: (i, 0)),     # temb tile
                pl.BlockSpec((Cout_p, Cout_p), lambda i: (0, 0)),   # W_proj
                pl.BlockSpec((1, Cout_p), lambda i: (0, 0)),        # b_fused (f32)
                pl.BlockSpec((Ct_p, Cout_p), lambda i: (0, 0)),     # W_time
                pl.BlockSpec((1, Cout_p), lambda i: (0, 0)),        # b_time (f32)
            ],
            out_specs=pl.BlockSpec((tile_n, Cout_p), lambda i: (i, 0)),
        ),
        compiler_params=cparams_par,
    )(h_scaled, e_feat, temb_p, w_proj, b_fused, w_time, b_time)

    hidden = hidden_p[:N, :Cout]
    # res_out: all-zeros buffer produced by the wrapper (free in XLA); skip it
    # entirely if the caller never reads it.
    res_out = (jnp.zeros_like(x),)
    return hidden, res_out


def conv_block_reference(x, H, temb, params):
    """Pure-JAX f32 reference for correctness checking."""
    x = x.astype(jnp.float32)
    H = H.astype(jnp.float32)
    y = x @ params["w_lin"]
    edge_deg = H.sum(0)
    node_deg = H.sum(1)
    b_inv = jnp.where(edge_deg > 0, 1.0 / edge_deg, 0.0)
    d_inv = jnp.where(node_deg > 0, 1.0 / node_deg, 0.0)
    e = (H.T @ y) * b_inv[:, None]
    conv = (H @ e) * d_inv[:, None] + params["b_conv"]
    hidden = conv @ params["w_proj"] + params["b_proj"]
    t_proj = _silu(temb.astype(jnp.float32)) @ params["w_time"] + params["b_time"]
    return _silu(hidden + t_proj)


def init_params(key, in_channels, out_channels, temb_channels):
    ks = jax.random.split(key, 6)
    scale = 0.1
    return {
        # stored already transposed to [in, out] so the kernel does x @ W
        "w_lin":  scale * jax.random.normal(ks[0], (in_channels, out_channels), jnp.float32),
        "b_conv": scale * jax.random.normal(ks[1], (1, out_channels), jnp.float32),
        "w_proj": scale * jax.random.normal(ks[2], (out_channels, out_channels), jnp.float32),
        "b_proj": scale * jax.random.normal(ks[3], (1, out_channels), jnp.float32),
        "w_time": scale * jax.random.normal(ks[4], (temb_channels, out_channels), jnp.float32),
        "b_time": scale * jax.random.normal(ks[5], (1, out_channels), jnp.float32),
    }


if __name__ == "__main__":
    # Small shapes consistent with the module's forward (graph-node layout).
    N = 1024          # graph nodes (2 node tiles of 512 -> exercises the 2-way split)
    M = 64            # hyperedges
    Cin = 4           # in_channels
    Cout = 32         # out_channels (heads=1, use_attention=False)
    Ct = 128          # temb_channels (kept small)

    key = jax.random.PRNGKey(0)
    k_x, k_h, k_t, k_p = jax.random.split(key, 4)

    x = jax.random.normal(k_x, (N, Cin), jnp.float32)
    # dense 0/1 incidence matrix  H[v, e] = 1 iff node v belongs to hyperedge e
    H = (jax.random.uniform(k_h, (N, M)) < 0.2).astype(jnp.float32)
    temb = jax.random.normal(k_t, (N, Ct), jnp.float32)
    params = init_params(k_p, Cin, Cout, Ct)

    hidden, res_out = conv_block_forward(x, H, temb, params, tile_n=512)
    jax.block_until_ready(hidden)
    jax.block_until_ready(res_out[0])

    assert hidden.shape == (N, Cout)
    assert res_out[0].shape == x.shape
    assert bool(jnp.all(jnp.isfinite(hidden)))

    ref = conv_block_reference(x, H, temb, params)
    max_err = float(jnp.max(jnp.abs(hidden.astype(jnp.float32) - ref)))
    # bf16-streamed operands introduce ~1e-3 relative error vs f32 reference
    # (flagged in the perf review); tolerance loosened accordingly.
    assert max_err < 5e-2, f"mismatch vs reference: max_err={max_err}"

    print("KERNEL_OK")
</pallas_src>

<mosaic_0001>
module attributes {stable_mosaic.version = 11 : i64} {
  func.func @_edge_feat_kernel(%arg0: i32, %arg1: i32, %arg2: memref<128x512xbf16, #tpu.memory_space<vmem>>, %arg3: memref<512x128xbf16, #tpu.memory_space<vmem>>, %arg4: memref<1x128x128xf32, #tpu.memory_space<vmem>>) attributes {dimension_semantics = [#tpu.dimension_semantics<parallel>, #tpu.dimension_semantics<arbitrary>], iteration_bounds = array<i64: 2, 1>, scalar_prefetch = 0 : i64, scratch_operands = 0 : i64, tpu.core_type = #tpu.core_type<tc>, window_params = [{transform_indices = @transform_0, window_bounds = array<i64: 128, 512>}, {transform_indices = @transform_1, window_bounds = array<i64: 512, 128>}, {transform_indices = @transform_2, window_bounds = array<i64: 1, 128, 128>}]} {
    %c0_i32 = arith.constant 0 : i32
    %0 = arith.cmpi eq, %arg1, %c0_i32 : i32
    %1 = arith.extui %0 : i1 to i32
    %c0_i32_0 = arith.constant 0 : i32
    %2 = arith.cmpi ne, %1, %c0_i32_0 : i32
    scf.if %2 {
      %cst_10 = arith.constant 0.000000e+00 : f32
      %12 = vector.broadcast %cst_10 : f32 to vector<128x128xf32>
      %c0_11 = arith.constant 0 : index
      %c0_12 = arith.constant 0 : index
      %c0_13 = arith.constant 0 : index
      %13 = vector.load %arg4[%c0_11, %c0_12, %c0_13] : memref<1x128x128xf32, #tpu.memory_space<vmem>>, vector<1x128x128xf32>
      %14 = vector.shape_cast %13 : vector<1x128x128xf32> to vector<128x128xf32>
      %15 = vector.shape_cast %12 : vector<128x128xf32> to vector<1x128x128xf32>
      tpu.vector_store %arg4[%c0_11, %c0_12, %c0_13], %15 {strides = array<i32>} : memref<1x128x128xf32, #tpu.memory_space<vmem>>, vector<1x128x128xf32>,
    } else {
    }
    %c0 = arith.constant 0 : index
    %c0_1 = arith.constant 0 : index
    %c0_2 = arith.constant 0 : index
    %3 = vector.load %arg4[%c0, %c0_1, %c0_2] : memref<1x128x128xf32, #tpu.memory_space<vmem>>, vector<1x128x128xf32>
    %4 = vector.shape_cast %3 : vector<1x128x128xf32> to vector<128x128xf32>
    %c0_3 = arith.constant 0 : index
    %c0_4 = arith.constant 0 : index
    %5 = vector.load %arg2[%c0_3, %c0_4] : memref<128x512xbf16, #tpu.memory_space<vmem>>, vector<128x512xbf16>
    %c0_5 = arith.constant 0 : index
    %c0_6 = arith.constant 0 : index
    %6 = vector.load %arg3[%c0_5, %c0_6] : memref<512x128xbf16, #tpu.memory_space<vmem>>, vector<512x128xbf16>
    %cst = arith.constant dense<0.000000e+00> : vector<128x128xf32>
    %7 = tpu.matmul %5, %6, %cst {dimension_numbers = #tpu.dot_dimension_numbers<[1], [0], [0], [1], [0, 0, 1, 1], [], []>} : vector<128x512xbf16>, vector<512x128xbf16>, vector<128x128xf32> -> vector<128x128xf32>
    %8 = arith.addf %4, %7 : vector<128x128xf32>
    %c0_7 = arith.constant 0 : index
    %c0_8 = arith.constant 0 : index
    %c0_9 = arith.constant 0 : index
    %9 = vector.load %arg4[%c0_7, %c0_8, %c0_9] : memref<1x128x128xf32, #tpu.memory_space<vmem>>, vector<1x128x128xf32>
    %10 = vector.shape_cast %9 : vector<1x128x128xf32> to vector<128x128xf32>
    %11 = vector.shape_cast %8 : vector<128x128xf32> to vector<1x128x128xf32>
    tpu.vector_store %arg4[%c0_7, %c0_8, %c0_9], %11 {strides = array<i32>} : memref<1x128x128xf32, #tpu.memory_space<vmem>>, vector<1x128x128xf32>,
    return
  }
  func.func @transform_0(%arg0: i32, %arg1: i32) -> (i32, i32) {
    %c1_i32 = arith.constant 1 : i32
    %0 = arith.muli %arg0, %c1_i32 : i32
    %1 = arith.addi %0, %arg1 : i32
    %c0_i32 = arith.constant 0 : i32
    %c0_i32_0 = arith.constant 0 : i32
    return %c0_i32, %1 : i32, i32
  }
  func.func @transform_1(%arg0: i32, %arg1: i32) -> (i32, i32) {
    %c1_i32 = arith.constant 1 : i32
    %0 = arith.muli %arg0, %c1_i32 : i32
    %1 = arith.addi %0, %arg1 : i32
    %c0_i32 = arith.constant 0 : i32
    %c0_i32_0 = arith.constant 0 : i32
    return %1, %c0_i32 : i32, i32
  }
  func.func @transform_2(%arg0: i32, %arg1: i32) -> (i32, i32, i32) {
    %c0_i32 = arith.constant 0 : i32
    %c0_i32_0 = arith.constant 0 : i32
    %c0_i32_1 = arith.constant 0 : i32
    return %arg0, %c0_i32, %c0_i32_0 : i32, i32, i32
  }
}

</mosaic_0001>

<bundles_post_ra>
// kernel: tpu_custom_call.1
= control target key start
LH: loop header
LB: loop body
LE: loop exit
PB: predicated region body
PF: predicated region fallthrough
CT: control target
= control target key end

     0   :  { %s1855_s0 = inlined_call_operand.hbm [shape: bf16[128,1024], index: 0, kind: input, shape index: {}]   ;;  %s1856_s1 = inlined_call_operand.hbm [shape: bf16[1024,128], index: 1, kind: input, shape index: {}]   ;;  %s1857_s2 = inlined_call_operand.hbm [shape: f32[2,128,128], index: 2, kind: output, shape index: {}]  }
   0x1   :  { %1858 = sst [smem:[#allocation11_spill]] %s1855_s0 }
   0x2   :  { %7 = vsyncpa [#allocation3], 0 }
   0x3   :  { %9 = vsyncpa [#allocation3 + $0x1], 0 }
   0x4   :  { %10 = vsyncpa [#allocation6], 0 }
   0x5   :  { %12 = vsyncpa [#allocation6 + $0x1], 0 }
   0x6   :  { %13 = vsyncpa [#allocation4], 0 }
   0x7   :  { %15 = vsyncpa [#allocation4 + $0x1], 0  ;;  %s1591_s9 = smov 0   ;;  %s1593_s10 = smov 0  }
   0x8   :  { %s1595_s11 = smov 0   ;;  %s1597_s12 = smov 0  }
   0x9   :  { %s1599_s13 = smov 0   ;;  %s1601_s14 = smov 0  }
   0xa LB: > { %s1055_s15 = sadd.s32 4294967295, %s1564_s14   ;;  %s1056_s16 = sadd.s32 4294967294, %s1564_s14   ;;  %s1564_s14 = sphi %s1601_s14, %s21_s14   ;;  %s1560_s13 = sphi %s1599_s13, %s1870_s13   ;;  %s1556_s12 = sphi %s1597_s12, %s1869_s12   ;;  %s1552_s11 = sphi %s1595_s11, %s1868_s11   ;;  %s1548_s10 = sphi %s1593_s10, %s1867_s10   ;;  %s1544_s9 = sphi %s1591_s9, %s1866_s9  }
   0xb   : > { %s33_s17 = sadd.s32 1, %s1560_s13  ;;  %s42_s18 = sadd.s32 1, %s1552_s11 }
   0xc   : > { %p35_p0 = scmp.ge.s32.totalorder %s33_s17, 2  ;;  %p49_p1 = scmp.ne.s32.totalorder %s1552_s11, %s1548_s10 }
   0xd   : > { %p50_p2 = scmp.eq.s32.totalorder %s1564_s14, 0  ;;  %p55_p3 = scmp.ne.s32.totalorder %s1548_s10, %s1544_s9 }
   0xe   : > { %s1872_s17 = smov (%p35_p0, %s33_s17), 0  ;;  %p56_p5 = scmp.eq.s32.totalorder %s1055_s15, 0 }
   0xf   : > { %p1632_p4 = por %p50_p2, %p49_p1  ;;  %s39_s20 = ssub.s32 %s1560_s13, %s1872_s17 }
  0x10   : > { %p107_p6 = scmp.eq.s32.totalorder %s1055_s15, 1  ;;  %p40_p7 = scmp.eq.s32.totalorder %s39_s20, 0 }
  0x11   : > { %p1638_p8 = por %p56_p5, %p55_p3  ;;  %p113_p10 = scmp.eq.s32.totalorder %s1056_s16, 1 }
  0x12   : > { %p1642_p9 = por %p107_p6, %p49_p1  ;;  %p1058_p12 = scmp.ge.s32.totalorder %s1564_s14, 2 }
  0x13   : > { %s1647_s23 = scalar_select %p40_p7, %s1552_s11, %s42_s18  }
  0x14   : > { %p1649_p11 = por %p113_p10, %p55_p3  ;;  %p1286_p13 = scmp.lt.s32.totalorder %s1564_s14, 2 }
  0x15   : > { %s1656_s25 = sand.u32 1, %s1552_s11   ;;  %s1138_s27 = sshll.u32 %s1560_s13, 8 }
  0x16   : > { %s1059_s26 = sshll.u32 %s1656_s25, 8  ;;  %s1863_s0 = sld [smem:[#allocation11_spill]] }
  0x17   : > { %s137_s3 = scalar_lea.vmem [#allocation2], %s1059_s26  ;;  %p1667_p0 = pnand %p1286_p13, %p1632_p4 }
  0x18   : > { %s145_s4 = sshll.u32 %s137_s3, 4  ;;  %s134_s6 = scalar_lea.sflag [#allocation3], %s1656_s25  ;;  %s146_s4 = int_to_ptr.vmem [resolvable:$true] %s145_s4 }
  0x19   : > { %p1426_p1 = pneg %p1667_p0  ;;  %s1437_s7 = scalar_lea.vmem %s146_s4, 4096 }
  0x1a   : > { %p1438_p2 = scmp.ne.s32.totalorder %s146_s4, %s1437_s7  ;;  %s1566_s8 = smov [#allocation2]  }
  0x1b   : > { %s1442_s15 = sshll.u32 %s1566_s8, 4  ;;  %s1443_s15 = int_to_ptr.vmem [resolvable:$false] %s1442_s15 }
  0x1c   : > { %s144_s30 = scalar_lea.hbm %s1863_s0, %s1138_s27  ;;  %p1440_p3 = pnand %p1438_p2, %p1426_p1 }
  0x1d   : > { %s1444_s16 = scalar_lea.vmem %s1443_s15, 8192  ;;  %p1445_p6 = scmp.lt.s32.totalorder %s146_s4, %s1443_s15 }
  0x1e   : > { %p1441_p5 = pneg %p1440_p3  ;;  %p1446_p4 = scmp.lt.s32.totalorder %s1444_s16, %s1437_s7 }
  0x20   : > { %p1447_p7 = por %p1446_p4, %p1445_p6 }
  0x22   : > { %p1448_p10 = pnand %p1447_p7, %p1441_p5 }
  0x24   : > { %1451 = shalt.err (!%p1448_p10)
}
  0x25   : > { %s1567_s18 = smov 512   ;;  %s1568_s19 = smov 256  }
  0x26   : > { %s1569_s20 = smov 16   ;;  %p1065_p13 = scmp.ge.s32.totalorder %s1564_s14, 1 }
  0x27   : > { %1278 = dma.hbm_to_vmem [thread:$0]  (!%p1667_p0), %s144_s30, 4096, %s146_s4, %s134_s6, %s1567_s18, %s1568_s19, %s1569_s20  }
  0x28   : > { %p175_p2 = scmp.lt.s32.totalorder %s1564_s14, 3  ;;  %s1139_s28 = sshll.u32 %s1560_s13, 12 }
  0x29   : > { %s166_s7 = scalar_lea.hbm %s1856_s1, %s1139_s28  ;;  %s159_s8 = scalar_lea.vmem [#allocation5], %s1059_s26 }
  0x2a   : > { %p1681_p3 = pnand %p1065_p13, %p175_p2  ;;  %s167_s15 = sshll.u32 %s159_s8, 4  ;;  %s168_s15 = int_to_ptr.vmem [resolvable:$true] %s167_s15 }
  0x2b   : > { %s156_s16 = scalar_lea.sflag [#allocation6], %s1656_s25  ;;  %s1465_s0 = scalar_lea.vmem %s168_s15, 4096 }
  0x2c   : > { %p1466_p5 = scmp.ne.s32.totalorder %s168_s15, %s1465_s0  ;;  %s1570_s30 = smov [#allocation5]  }
  0x2d   : > { %s1470_s4 = sshll.u32 %s1570_s30, 4  ;;  %s1471_s4 = int_to_ptr.vmem [resolvable:$false] %s1470_s4 }
  0x2e   : > { %p1468_p6 = pnand %p1466_p5, %p1426_p1  ;;  %s1472_s6 = scalar_lea.vmem %s1471_s4, 8192 }
  0x2f   : > { %p1473_p7 = scmp.lt.s32.totalorder %s168_s15, %s1471_s4  ;;  %p1474_p10 = scmp.lt.s32.totalorder %s1472_s6, %s1465_s0 }
  0x30   : > { %p1469_p4 = pneg %p1468_p6 }
  0x31   : > { %p1475_p13 = por %p1474_p10, %p1473_p7 }
  0x33   : > { %p1476_p2 = pnand %p1475_p13, %p1469_p4 }
  0x35   : > { %1479 = shalt.err (!%p1476_p2)
}
  0x36   : > { %s1571_s18 = smov 64   ;;  %s1572_s26 = smov 4  }
  0x37   : > { %1281 = dma.hbm_to_vmem [thread:$0]  (!%p1667_p0), %s166_s7, 4096, %s168_s15, %s156_s16, %s1571_s18, %s1571_s18, %s1572_s26  }
  0x38   : > { %179 = sbr.rel (%p1681_p3) target bundleno = 372 (0x174), region = 28  ;;  %s1700_s25 = sand.u32 (!%p1681_p3), 1, %s1548_s10  }
  0x39   : > { %s1066_s19 = sshll.u32 (!%p1681_p3), %s1700_s25, 8  ;;  %s182_s20 = scalar_lea.sflag (!%p1681_p3), [#allocation3], %s1700_s25 }
  0x3a   : > { %s1704_s0 = scalar_lea.vmem (!%p1681_p3), [#allocation2], %s1066_s19 }
  0x3d   : > { %1531 = dma.done.wait (%p1638_p8), %s182_s20, 4096  }
  0x3e   : > { %1533 = vsyncadd (%p1638_p8), %s182_s20, 4294963200  ;;  %s191_s5 = scalar_lea.sflag [#allocation6], %s1700_s25  ;;  %s1711_s27 = scalar_lea.vmem [#allocation5], %s1066_s19 }
  0x3f   : > { %1535 = dma.done.wait (%p1638_p8), %s191_s5, 4096  }
  0x40   : > { %1537 = vsyncadd (%p1638_p8), %s191_s5, 4294963200  ;;  %v1344_v0 = vld [vmem:[%s1711_s27 + $0x78] sm:$0xff]   ;;  %v1348_v4 = vld [vmem:[%s1711_s27 + $0x70] sm:$0xff]   ;;  %s1068_s21 = sshll.u32 %s1700_s25, 7  ;;  %s1140_s29 = sshll.u32 %s1556_s12, 11 }
  0x41   : > { %v1345_v1 = vld [vmem:[%s1711_s27 + $0xf8] sm:$0xff]   ;;  %1141 = vmatprep.subr.bf16.mxu0 %v1344_v0  ;;  %v1349_v5 = vld [vmem:[%s1711_s27 + $0xf0] sm:$0xff]   ;;  %v1352_v8 = vld [vmem:[%s1711_s27 + $0x68] sm:$0xff]   ;;  %s1782_s28 = scalar_lea.vmem [#allocation7], %s1068_s21  ;;  %s1804_s15 = scalar_lea.hbm %s1857_s2, %s1140_s29 }
  0x42   : > { %v1346_v2 = vld [vmem:[%s1711_s27 + $0x38] sm:$0xff]   ;;  %1205 = vmatprep.subr.bf16.mxu1 %v1345_v1  ;;  %v1350_v6 = vld [vmem:[%s1711_s27 + $0x30] sm:$0xff]   ;;  %v1353_v9 = vld [vmem:[%s1711_s27 + $0xe8] sm:$0xff]   ;;  %s949_s3 = sshll.u32 %s1782_s28, 4  ;;  %s936_s16 = scalar_lea.sflag [#allocation4], %s1700_s25  ;;  %s1806_s3 = int_to_ptr.vmem [resolvable:$true] %s949_s3 }
  0x43   : > { %v1347_v3 = vld [vmem:[%s1711_s27 + $0xb8] sm:$0xff]   ;;  %1142 = vmatpush3.bf16.msra.mxu0 %v1346_v2  ;;  %v1351_v7 = vld [vmem:[%s1711_s27 + $0xb0] sm:$0xff]   ;;  %v1354_v10 = vld [vmem:[%s1711_s27 + $0x28] sm:$0xff]   ;;  %s1480_s30 = scalar_lea.vmem %s1806_s3, 2048  ;;  %s1573_s12 = smov [#allocation7]  }
  0x44   : > { %1206 = vmatpush3.bf16.msra.mxu1 %v1347_v3  ;;  %1143 = vmatprep.subr.bf16.mxu0 %v1348_v4  ;;  %v1355_v11 = vld [vmem:[%s1711_s27 + $0xa8] sm:$0xff]   ;;  %v1356_v12 = vld [vmem:[%s1711_s27 + $0x60] sm:$0xff]   ;;  %v1360_v16 = vld [vmem:[%s1711_s27 + $0x58] sm:$0xff]   ;;  %p1481_p8 = scmp.ne.s32.totalorder %s1806_s3, %s1480_s30  ;;  %s1484_s4 = sshll.u32 %s1573_s12, 4  ;;  %s1485_s4 = int_to_ptr.vmem [resolvable:$false] %s1484_s4 }
  0x45   : > { %1207 = vmatprep.subr.bf16.mxu1 %v1349_v5  ;;  %v1357_v13 = vld [vmem:[%s1711_s27 + $0xe0] sm:$0xff]   ;;  %v1361_v17 = vld [vmem:[%s1711_s27 + $0xd8] sm:$0xff]   ;;  %v1364_v20 = vld [vmem:[%s1711_s27 + $0x50] sm:$0xff]   ;;  %s1486_s6 = scalar_lea.vmem %s1485_s4, 4096  ;;  %p1487_p3 = scmp.lt.s32.totalorder %s1806_s3, %s1485_s4 }
  0x46   : > { %v1358_v14 = vld [vmem:[%s1711_s27 + $0x20] sm:$0xff]   ;;  %v1362_v18 = vld [vmem:[%s1711_s27 + $0x18] sm:$0xff]   ;;  %v1365_v21 = vld [vmem:[%s1711_s27 + $0xd0] sm:$0xff]   ;;  %p1482_p0 = pnand %p1481_p8, %p1642_p9  ;;  %p1488_p5 = scmp.lt.s32.totalorder %s1486_s6, %s1480_s30 }
  0x47   : > { %1144 = vmatpush3.bf16.msra.mxu0 %v1350_v6  ;;  %v1359_v15 = vld [vmem:[%s1711_s27 + $0xa0] sm:$0xff]   ;;  %v1363_v19 = vld [vmem:[%s1711_s27 + $0x98] sm:$0xff]   ;;  %v1366_v22 = vld [vmem:[%s1711_s27 + $0x10] sm:$0xff]  }
  0x48   : > { %1208 = vmatpush3.bf16.msra.mxu1 %v1351_v7  ;;  %1145 = vmatprep.subr.bf16.mxu0 %v1352_v8  ;;  %v1367_v23 = vld [vmem:[%s1711_s27 + $0x90] sm:$0xff]   ;;  %v1368_v24 = vld [vmem:[%s1711_s27 + $0x48] sm:$0xff]   ;;  %v1372_v28 = vld [vmem:[%s1711_s27 + $0x40] sm:$0xff]   ;;  %p1483_p1 = pneg %p1482_p0  ;;  %p1489_p6 = por %p1488_p5, %p1487_p3 }
  0x49   : > { %1209 = vmatprep.subr.bf16.mxu1 %v1353_v9  ;;  %v1369_v25 = vld [vmem:[%s1711_s27 + $0xc8] sm:$0xff]   ;;  %v1373_v29 = vld [vmem:[%s1711_s27 + $0xc0] sm:$0xff]  }
  0x4a   : > { %v1370_v26 = vld [vmem:[%s1711_s27 + $0x8] sm:$0xff]   ;;  %v1374_v30 = vld [vmem:[%s1711_s27] sm:$0xff]   ;;  %p1490_p4 = pnand %p1489_p6, %p1483_p1 }
  0x4b   : > { %1146 = vmatpush3.bf16.msra.mxu0 %v1354_v10  ;;  %v1371_v27 = vld [vmem:[%s1711_s27 + $0x88] sm:$0xff]   ;;  %v1375_v31 = vld [vmem:[%s1711_s27 + $0x80] sm:$0xff]  }
  0x4c   : > { %1210 = vmatpush3.bf16.msra.mxu1 %v1355_v11  ;;  %1147 = vmatprep.subr.bf16.mxu0 %v1356_v12  ;;  %v1376_v32 = vld [vmem:[%s1704_s0] ss:$16 sps:$4 sm:$0xff]   ;;  %v1378_v33 = vld [vmem:[%s1704_s0 + $0x4] ss:$16 sps:$4 sm:$0xff]   ;;  %v1379_v34 = vld [vmem:[%s1704_s0 + $0x8] ss:$16 sps:$4 sm:$0xff]  }
  0x4d   : > { %1211 = vmatprep.subr.bf16.mxu1 %v1357_v13  ;;  %v1381_v35 = vld [vmem:[%s1704_s0 + $0xc] ss:$16 sps:$4 sm:$0xff]   ;;  %741 = vmatprep.mubr.bf16.mxu0 %v1378_v33  ;;  %v1382_v36 = vld [vmem:[%s1704_s0 + $0x24] ss:$16 sps:$4 sm:$0xff]   ;;  %v1386_v38 = vld [vmem:[%s1704_s0 + $0x20] ss:$16 sps:$4 sm:$0xff]  }
  0x4e   : > { %838 = vmatprep.mubr.bf16.mxu1 %v1381_v35  ;;  %v1384_v37 = vld [vmem:[%s1704_s0 + $0x2c] ss:$16 sps:$4 sm:$0xff]   ;;  %v1387_v39 = vld [vmem:[%s1704_s0 + $0x28] ss:$16 sps:$4 sm:$0xff]   ;;  %v1388_v40 = vld [vmem:[%s1704_s0 + $0x44] ss:$16 sps:$4 sm:$0xff]  }
  0x4f   : > { %1148 = vmatpush3.bf16.msra.mxu0 %v1358_v14  ;;  %v1390_v41 = vld [vmem:[%s1704_s0 + $0x4c] ss:$16 sps:$4 sm:$0xff]   ;;  %v1392_v42 = vld [vmem:[%s1704_s0 + $0x40] ss:$16 sps:$4 sm:$0xff]   ;;  %v1393_v43 = vld [vmem:[%s1704_s0 + $0x48] ss:$16 sps:$4 sm:$0xff]  }
  0x50   : > { %1212 = vmatpush3.bf16.msra.mxu1 %v1359_v15  ;;  %1149 = vmatprep.subr.bf16.mxu0 %v1360_v16  ;;  %v1394_v44 = vld [vmem:[%s1704_s0 + $0x64] ss:$16 sps:$4 sm:$0xff]   ;;  %v1396_v45 = vld [vmem:[%s1704_s0 + $0x6c] ss:$16 sps:$4 sm:$0xff]   ;;  %v1398_v46 = vld [vmem:[%s1704_s0 + $0x60] ss:$16 sps:$4 sm:$0xff]  }
  0x51   : > { %1213 = vmatprep.subr.bf16.mxu1 %v1361_v17  ;;  %v1399_v47 = vld [vmem:[%s1704_s0 + $0x68] ss:$16 sps:$4 sm:$0xff]   ;;  %v1400_v48 = vld [vmem:[%s1704_s0 + $0x84] ss:$16 sps:$4 sm:$0xff]   ;;  %v1402_v49 = vld [vmem:[%s1704_s0 + $0x8c] ss:$16 sps:$4 sm:$0xff]  }
  0x52   : > { %v1404_v50 = vld [vmem:[%s1704_s0 + $0x80] ss:$16 sps:$4 sm:$0xff]   ;;  %v1405_v51 = vld [vmem:[%s1704_s0 + $0x88] ss:$16 sps:$4 sm:$0xff]   ;;  %v1406_v52 = vld [vmem:[%s1704_s0 + $0xa4] ss:$16 sps:$4 sm:$0xff]  }
  0x53   : > { %1150 = vmatpush3.bf16.msra.mxu0 %v1362_v18  ;;  %v1408_v53 = vld [vmem:[%s1704_s0 + $0xac] ss:$16 sps:$4 sm:$0xff]   ;;  %v1410_v54 = vld [vmem:[%s1704_s0 + $0xa0] ss:$16 sps:$4 sm:$0xff]   ;;  %v1411_v55 = vld [vmem:[%s1704_s0 + $0xa8] ss:$16 sps:$4 sm:$0xff]  }
  0x54   : > { %1214 = vmatpush3.bf16.msra.mxu1 %v1363_v19  ;;  %1151 = vmatprep.subr.bf16.mxu0 %v1364_v20  ;;  %v1412_v56 = vld [vmem:[%s1704_s0 + $0xc4] ss:$16 sps:$4 sm:$0xff]   ;;  %v1414_v57 = vld [vmem:[%s1704_s0 + $0xcc] ss:$16 sps:$4 sm:$0xff]   ;;  %v1416_v58 = vld [vmem:[%s1704_s0 + $0xc0] ss:$16 sps:$4 sm:$0xff]  }
  0x55   : > { %1215 = vmatprep.subr.bf16.mxu1 %v1365_v21  ;;  %v1417_v59 = vld [vmem:[%s1704_s0 + $0xc8] ss:$16 sps:$4 sm:$0xff]   ;;  %v1418_v60 = vld [vmem:[%s1704_s0 + $0xe4] ss:$16 sps:$4 sm:$0xff]   ;;  %v1420_v61 = vld [vmem:[%s1704_s0 + $0xec] ss:$16 sps:$4 sm:$0xff]  }
  0x56   : > { %v1422_v62 = vld [vmem:[%s1704_s0 + $0xe0] ss:$16 sps:$4 sm:$0xff]   ;;  %v1423_v63 = vld [vmem:[%s1704_s0 + $0xe8] ss:$16 sps:$4 sm:$0xff]  }
  0x57   : > { %1152 = vmatpush3.bf16.msra.mxu0 %v1366_v22 }
  0x58   : > { %1216 = vmatpush3.bf16.msra.mxu1 %v1367_v23  ;;  %1153 = vmatprep.subr.bf16.mxu0 %v1368_v24 }
  0x59   : > { %1217 = vmatprep.subr.bf16.mxu1 %v1369_v25 }
  0x5b   : > { %1154 = vmatpush3.bf16.msra.mxu0 %v1370_v26 }
  0x5c   : > { %1218 = vmatpush3.bf16.msra.mxu1 %v1371_v27  ;;  %1155 = vmatprep.subr.bf16.mxu0 %v1372_v28 }
  0x5d   : > { %1219 = vmatprep.subr.bf16.mxu1 %v1373_v29 }
  0x5f   : > { %1156 = vmatpush3.bf16.msra.mxu0 %v1374_v30 }
  0x60   : > { %1220 = vmatpush3.bf16.msra.mxu1 %v1375_v31 }
  0x62   : > { %742 = vmatmul.mubr.bf16.vlgmr.msra.gmra.mxu0 %v1376_v32 }
  0x63   : > { %839 = vmatmul.mubr.bf16.vlgmr.msra.gmra.mxu1 %v1379_v34  ;;  %749 = vmatprep.mubr.bf16.mxu0 %v1382_v36 }
  0x64   : > { %846 = vmatprep.mubr.bf16.mxu1 %v1384_v37 }
  0x6a   : > { %750 = vmatmul.mubr.bf16.gmra.mxu0 %v1386_v38 }
  0x6b   : > { %847 = vmatmul.mubr.bf16.gmra.mxu1 %v1387_v39  ;;  %757 = vmatprep.mubr.bf16.mxu0 %v1388_v40 }
  0x6c   : > { %854 = vmatprep.mubr.bf16.mxu1 %v1390_v41 }
  0x72   : > { %758 = vmatmul.mubr.bf16.gmra.mxu0 %v1392_v42 }
  0x73   : > { %855 = vmatmul.mubr.bf16.gmra.mxu1 %v1393_v43  ;;  %765 = vmatprep.mubr.bf16.mxu0 %v1394_v44 }
  0x74   : > { %862 = vmatprep.mubr.bf16.mxu1 %v1396_v45 }
  0x7a   : > { %766 = vmatmul.mubr.bf16.gmra.mxu0 %v1398_v46 }
  0x7b   : > { %863 = vmatmul.mubr.bf16.gmra.mxu1 %v1399_v47  ;;  %773 = vmatprep.mubr.bf16.mxu0 %v1400_v48 }
  0x7c   : > { %870 = vmatprep.mubr.bf16.mxu1 %v1402_v49 }
  0x82   : > { %774 = vmatmul.mubr.bf16.gmra.mxu0 %v1404_v50 }
  0x83   : > { %871 = vmatmul.mubr.bf16.gmra.mxu1 %v1405_v51  ;;  %781 = vmatprep.mubr.bf16.mxu0 %v1406_v52 }
  0x84   : > { %878 = vmatprep.mubr.bf16.mxu1 %v1408_v53 }
  0x8a   : > { %782 = vmatmul.mubr.bf16.gmra.mxu0 %v1410_v54 }
  0x8b   : > { %879 = vmatmul.mubr.bf16.gmra.mxu1 %v1411_v55  ;;  %789 = vmatprep.mubr.bf16.mxu0 %v1412_v56 }
  0x8c   : > { %886 = vmatprep.mubr.bf16.mxu1 %v1414_v57 }
  0x92   : > { %790 = vmatmul.mubr.bf16.gmra.mxu0 %v1416_v58 }
  0x93   : > { %887 = vmatmul.mubr.bf16.gmra.mxu1 %v1417_v59  ;;  %797 = vmatprep.mubr.bf16.mxu0 %v1418_v60 }
  0x94   : > { %894 = vmatprep.mubr.bf16.mxu1 %v1420_v61 }
  0x9a   : > { %798 = vmatmul.mubr.bf16.gmra.mxu0 %v1422_v62 }
  0x9b   : > { %895 = vmatmul.mubr.bf16.gmra.mxu1 %v1423_v63 }
 0x122   : > { %v1157_v0 = vpop.f32.mrf.mxu0 }
 0x123   : > { %v1221_v1 = vpop.f32.mrf.mxu1 }
 0x124   : > { %v1158_v2 = vpop.f32.mrf.mxu0 }
 0x125   : > { %v1159_v3 = vadd.f32 %v1158_v2, %v1157_v0  ;;  %v1222_v4 = vpop.f32.mrf.mxu1 }
 0x126   : > { %v1223_v5 = vadd.f32 %v1222_v4, %v1221_v1  ;;  %v1160_v6 = vpop.f32.mrf.mxu0 }
 0x127   : > { %v1224_v7 = vpop.f32.mrf.mxu1 }
 0x128   : > { %v841_v8 = vadd.f32 %v1223_v5, %v1159_v3  ;;  %v1161_v9 = vpop.f32.mrf.mxu0 }
 0x129   : > { %v1162_v10 = vadd.f32 %v1161_v9, %v1160_v6  ;;  %v1225_v11 = vpop.f32.mrf.mxu1 }
 0x12a   : > { %v1226_v12 = vadd.f32 %v1225_v11, %v1224_v7  ;;  %v1163_v13 = vpop.f32.mrf.mxu0  ;;  %919 = vst [vmem:[%s1782_s28] sm:$0xff] %v841_v8 }
 0x12b   : > { %v1227_v14 = vpop.f32.mrf.mxu1 }
 0x12c   : > { %v844_v15 = vadd.f32 %v1226_v12, %v1162_v10  ;;  %v1164_v16 = vpop.f32.mrf.mxu0 }
 0x12d   : > { %v1165_v17 = vadd.f32 %v1164_v16, %v1163_v13  ;;  %v1228_v18 = vpop.f32.mrf.mxu1 }
 0x12e   : > { %v1229_v19 = vadd.f32 %v1228_v18, %v1227_v14  ;;  %v1166_v20 = vpop.f32.mrf.mxu0  ;;  %920 = vst [vmem:[%s1782_s28 + $0x8] sm:$0xff] %v844_v15 }
 0x12f   : > { %v1230_v21 = vpop.f32.mrf.mxu1 }
 0x130   : > { %v849_v22 = vadd.f32 %v1229_v19, %v1165_v17  ;;  %v1167_v23 = vpop.f32.mrf.mxu0 }
 0x131   : > { %v1168_v24 = vadd.f32 %v1167_v23, %v1166_v20  ;;  %v1231_v25 = vpop.f32.mrf.mxu1 }
 0x132   : > { %v1232_v26 = vadd.f32 %v1231_v25, %v1230_v21  ;;  %v1169_v27 = vpop.f32.mrf.mxu0  ;;  %921 = vst [vmem:[%s1782_s28 + $0x10] sm:$0xff] %v849_v22 }
 0x133   : > { %v1233_v28 = vpop.f32.mrf.mxu1 }
 0x134   : > { %v852_v29 = vadd.f32 %v1232_v26, %v1168_v24  ;;  %v1170_v30 = vpop.f32.mrf.mxu0 }
 0x135   : > { %v1171_v31 = vadd.f32 %v1170_v30, %v1169_v27  ;;  %v1234_v32 = vpop.f32.mrf.mxu1 }
 0x136   : > { %v1235_v33 = vadd.f32 %v1234_v32, %v1233_v28  ;;  %v1172_v34 = vpop.f32.mrf.mxu0  ;;  %922 = vst [vmem:[%s1782_s28 + $0x18] sm:$0xff] %v852_v29 }
 0x137   : > { %v1236_v35 = vpop.f32.mrf.mxu1 }
 0x138   : > { %v857_v36 = vadd.f32 %v1235_v33, %v1171_v31  ;;  %v1173_v37 = vpop.f32.mrf.mxu0 }
 0x139   : > { %v1174_v38 = vadd.f32 %v1173_v37, %v1172_v34  ;;  %v1237_v39 = vpop.f32.mrf.mxu1 }
 0x13a   : > { %v1238_v40 = vadd.f32 %v1237_v39, %v1236_v35  ;;  %v1175_v41 = vpop.f32.mrf.mxu0  ;;  %923 = vst [vmem:[%s1782_s28 + $0x20] sm:$0xff] %v857_v36 }
 0x13b   : > { %v1239_v42 = vpop.f32.mrf.mxu1 }
 0x13c   : > { %v860_v43 = vadd.f32 %v1238_v40, %v1174_v38  ;;  %v1176_v44 = vpop.f32.mrf.mxu0 }
 0x13d   : > { %v1177_v45 = vadd.f32 %v1176_v44, %v1175_v41  ;;  %v1240_v46 = vpop.f32.mrf.mxu1 }
 0x13e   : > { %v1241_v47 = vadd.f32 %v1240_v46, %v1239_v42  ;;  %v1178_v48 = vpop.f32.mrf.mxu0  ;;  %924 = vst [vmem:[%s1782_s28 + $0x28] sm:$0xff] %v860_v43 }
 0x13f   : > { %v1242_v49 = vpop.f32.mrf.mxu1 }
 0x140   : > { %v865_v50 = vadd.f32 %v1241_v47, %v1177_v45  ;;  %v1179_v51 = vpop.f32.mrf.mxu0 }
 0x141   : > { %v1180_v52 = vadd.f32 %v1179_v51, %v1178_v48  ;;  %v1243_v53 = vpop.f32.mrf.mxu1 }
 0x142   : > { %v1244_v54 = vadd.f32 %v1243_v53, %v1242_v49  ;;  %v1181_v55 = vpop.f32.mrf.mxu0  ;;  %925 = vst [vmem:[%s1782_s28 + $0x30] sm:$0xff] %v865_v50 }
 0x143   : > { %v1245_v56 = vpop.f32.mrf.mxu1 }
 0x144   : > { %v868_v57 = vadd.f32 %v1244_v54, %v1180_v52  ;;  %v1182_v58 = vpop.f32.mrf.mxu0 }
 0x145   : > { %v1183_v59 = vadd.f32 %v1182_v58, %v1181_v55  ;;  %v1246_v60 = vpop.f32.mrf.mxu1 }
 0x146   : > { %v1247_v61 = vadd.f32 %v1246_v60, %v1245_v56  ;;  %v1184_v62 = vpop.f32.mrf.mxu0  ;;  %926 = vst [vmem:[%s1782_s28 + $0x38] sm:$0xff] %v868_v57 }
 0x147   : > { %v1248_v63 = vpop.f32.mrf.mxu1 }
 0x148   : > { %v873_v0 = vadd.f32 %v1247_v61, %v1183_v59  ;;  %v1185_v1 = vpop.f32.mrf.mxu0 }
 0x149   : > { %v1186_v2 = vadd.f32 %v1185_v1, %v1184_v62  ;;  %v1249_v3 = vpop.f32.mrf.mxu1 }
 0x14a   : > { %v1250_v4 = vadd.f32 %v1249_v3, %v1248_v63  ;;  %v1187_v5 = vpop.f32.mrf.mxu0  ;;  %927 = vst [vmem:[%s1782_s28 + $0x40] sm:$0xff] %v873_v0 }
 0x14b   : > { %v1251_v6 = vpop.f32.mrf.mxu1 }
 0x14c   : > { %v876_v7 = vadd.f32 %v1250_v4, %v1186_v2  ;;  %v1188_v8 = vpop.f32.mrf.mxu0 }
 0x14d   : > { %v1189_v9 = vadd.f32 %v1188_v8, %v1187_v5  ;;  %v1252_v10 = vpop.f32.mrf.mxu1 }
 0x14e   : > { %v1253_v11 = vadd.f32 %v1252_v10, %v1251_v6  ;;  %v1190_v12 = vpop.f32.mrf.mxu0  ;;  %928 = vst [vmem:[%s1782_s28 + $0x48] sm:$0xff] %v876_v7 }
 0x14f   : > { %v1254_v13 = vpop.f32.mrf.mxu1 }
 0x150   : > { %v881_v14 = vadd.f32 %v1253_v11, %v1189_v9  ;;  %v1191_v15 = vpop.f32.mrf.mxu0 }
 0x151   : > { %v1192_v16 = vadd.f32 %v1191_v15, %v1190_v12  ;;  %v1255_v17 = vpop.f32.mrf.mxu1 }
 0x152   : > { %v1256_v18 = vadd.f32 %v1255_v17, %v1254_v13  ;;  %v1193_v19 = vpop.f32.mrf.mxu0  ;;  %929 = vst [vmem:[%s1782_s28 + $0x50] sm:$0xff] %v881_v14 }
 0x153   : > { %v1257_v20 = vpop.f32.mrf.mxu1 }
 0x154   : > { %v884_v21 = vadd.f32 %v1256_v18, %v1192_v16  ;;  %v1194_v22 = vpop.f32.mrf.mxu0 }
 0x155   : > { %v1195_v23 = vadd.f32 %v1194_v22, %v1193_v19  ;;  %v1258_v24 = vpop.f32.mrf.mxu1 }
 0x156   : > { %v1259_v25 = vadd.f32 %v1258_v24, %v1257_v20  ;;  %v1196_v26 = vpop.f32.mrf.mxu0  ;;  %930 = vst [vmem:[%s1782_s28 + $0x58] sm:$0xff] %v884_v21 }
 0x157   : > { %v1260_v27 = vpop.f32.mrf.mxu1 }
 0x158   : > { %v889_v28 = vadd.f32 %v1259_v25, %v1195_v23  ;;  %v1197_v29 = vpop.f32.mrf.mxu0 }
 0x159   : > { %v1198_v30 = vadd.f32 %v1197_v29, %v1196_v26  ;;  %v1261_v31 = vpop.f32.mrf.mxu1 }
 0x15a   : > { %v1262_v32 = vadd.f32 %v1261_v31, %v1260_v27  ;;  %v1199_v33 = vpop.f32.mrf.mxu0  ;;  %931 = vst [vmem:[%s1782_s28 + $0x60] sm:$0xff] %v889_v28 }
 0x15b   : > { %v1263_v34 = vpop.f32.mrf.mxu1 }
 0x15c   : > { %v892_v35 = vadd.f32 %v1262_v32, %v1198_v30  ;;  %v1200_v36 = vpop.f32.mrf.mxu0 }
 0x15d   : > { %v1201_v37 = vadd.f32 %v1200_v36, %v1199_v33  ;;  %v1264_v38 = vpop.f32.mrf.mxu1 }
 0x15e   : > { %v1265_v39 = vadd.f32 %v1264_v38, %v1263_v34  ;;  %v1202_v40 = vpop.f32.mrf.mxu0  ;;  %932 = vst [vmem:[%s1782_s28 + $0x68] sm:$0xff] %v892_v35 }
 0x15f   : > { %v1266_v41 = vpop.f32.mrf.mxu1 }
 0x160   : > { %v897_v42 = vadd.f32 %v1265_v39, %v1201_v37  ;;  %v1203_v43 = vpop.f32.mrf.mxu0 }
 0x161   : > { %v1204_v44 = vadd.f32 %v1203_v43, %v1202_v40  ;;  %v1267_v45 = vpop.f32.mrf.mxu1 }
 0x162   : > { %v1268_v46 = vadd.f32 %v1267_v45, %v1266_v41  ;;  %933 = vst [vmem:[%s1782_s28 + $0x70] sm:$0xff] %v897_v42 }
 0x164   : > { %v900_v47 = vadd.f32 %v1268_v46, %v1204_v44 }
 0x166   : > { %934 = vst [vmem:[%s1782_s28 + $0x78] sm:$0xff] %v900_v47 }
 0x167   : > { %1493 = shalt.err (!%p1490_p4)
}
 0x168   : > { %s1494_s18 = scalar_lea.hbm %s1804_s15, 2048  ;;  %s1498_s20 = scalar_lea.hbm %s1857_s2, 4096 }
 0x169   : > { %p1495_p7 = scmp.ne.s32.totalorder %s1804_s15, %s1494_s18  ;;  %p1499_p2 = scmp.lt.s32.totalorder %s1804_s15, %s1857_s2 }
 0x16a   : > { %p1500_p8 = scmp.lt.s32.totalorder %s1498_s20, %s1494_s18 }
 0x16b   : > { %p1496_p10 = pnand %p1495_p7, %p1642_p9 }
 0x16c   : > { %p1501_p0 = por %p1500_p8, %p1499_p2 }
 0x16d   : > { %p1497_p13 = pneg %p1496_p10 }
 0x16f   : > { %p1502_p1 = pnand %p1501_p0, %p1497_p13 }
 0x171   : > { %1505 = shalt.err (!%p1502_p1)
}
 0x172   : > { %s1574_s27 = smov 128   ;;  %s1575_s21 = smov 8  }
 0x173   : > { %1273 = dma.vmem_to_hbm [thread:$0]  (%p1642_p9), %s1806_s3, 2048, %s1804_s15, %s936_s16, %s1574_s27, %s1574_s27, %s1575_s21  }
 0x174 PF: > { %s964_s28 = sand.u32 1, %s1544_s9   ;;  %p1283_p3 = pnand %p1058_p12, %p1649_p11 }
 0x175   : > { %s965_s29 = scalar_lea.sflag [#allocation4], %s964_s28 }
 0x176   : > { %p1284_p5 = pneg %p1283_p3 }
 0x178   : > { %1539 = dma.done.wait (%p1284_p5), %s965_s29, 2048  }
 0x179   : > { %1541 = vsyncadd (%p1284_p5), %s965_s29, 4294965248  ;;  %s21_s14 = sadd.s32 1, %s1564_s14   ;;  %s1866_s9 = smov %s1548_s10 }
 0x17a   : > { %p18_p6 = scmp.ge.s32.totalorder %s21_s14, 4   ;;  %s1867_s10 = smov %s1552_s11 }
 0x17b   : > { %s1868_s11 = smov %s1647_s23  ;;  %s1869_s12 = smov %s1560_s13 }
 0x17c   : > { %s1870_s13 = smov %s1872_s17  ;;  %20 = sbr.rel (!%p18_p6) target bundleno = 10 (0xa), region = 90 }
 0x181   :  { %970 = vsyncpa [#allocation3], 1 }
 0x182   :  { %972 = vsyncpa [#allocation3 + $0x1], 1 }
 0x183   :  { %973 = vsyncpa [#allocation6], 1 }
 0x184   :  { %975 = vsyncpa [#allocation6 + $0x1], 1 }
 0x185   :  { %976 = vsyncpa [#allocation4], 1 }
 0x186   :  { %978 = vsyncpa [#allocation4 + $0x1], 1 }

</bundles_post_ra>
